<compile_context>
chip_gen: v7x
topology: tpu7x:2x2x1
jax: 0.10.0
libtpu: 0.0.40
codegen_flags: <defaults>
</compile_context>

<pallas_src>
import functools

import jax
import jax.numpy as jnp
from jax.experimental import pallas as pl
from jax.experimental.pallas import tpu as pltpu


def _round_up(x, m):
    return (x + m - 1) // m * m


# ----------------------------- Pallas kernel --------------------------------
def _mnf_linear_kernel(x_ref, wmu_ref, wls_ref, eps_ref, z_ref,
                       bmu_ref, blv_ref, beps_ref,
                       out_ref, part_ref, acc_ref, *,
                       threshold_var, batch):
    """Grid = (out_tiles, in_tiles); the in_features axis (last) is reduced."""
    k = pl.program_id(1)
    nk = pl.num_programs(1)

    @pl.when(k == 0)
    def _init():
        acc_ref[...] = jnp.zeros_like(acc_ref)
        part_ref[...] = jnp.zeros_like(part_ref)

    # stochastic weight tile (params stored bf16; all math in f32)
    z = z_ref[...].astype(jnp.float32)               # (1, TK)
    wmu = wmu_ref[...].astype(jnp.float32)           # (TO, TK)
    wls = wls_ref[...].astype(jnp.float32)
    eps = eps_ref[...].astype(jnp.float32)

    e = jnp.exp(wls)                                 # single EUP exp, reused
    wmu_z = z * wmu
    weight = wmu_z + jnp.minimum(e, threshold_var) * eps

    # fused matmul: rows 0..B-1 = batch, row B = rzero_c
    xa = x_ref[...].astype(jnp.float32)              # (B+1, TK)
    acc_ref[...] += jax.lax.dot_general(
        xa, weight, (((1,), (1,)), ((), ())),
        preferred_element_type=jnp.float32)

    # weight-KL partial for this tile (e*e == exp(2*logstd))
    klw_step = jnp.sum(0.5 * (-2.0 * wls + e * e + wmu_z * wmu_z - 1.0))
    lane = jax.lax.broadcasted_iota(jnp.int32, part_ref.shape, 2)
    part_ref[...] += jnp.where(lane == 0, klw_step, 0.0)

    @pl.when(k == nk - 1)
    def _finalize():
        acc = acc_ref[...]
        # bias sampling + bias-KL for this out-tile (fused surrounding glue)
        bmu = bmu_ref[...]
        blv = blv_ref[...]
        e_b = jnp.exp(0.5 * blv)
        bias = bmu + jnp.minimum(e_b, threshold_var) * beps_ref[...]
        out_ref[...] = (acc[:batch, :] + bias).astype(out_ref.dtype)
        # cw = tanh(rzero_c @ W.T); only its sum over out_features is needed
        cw_sum = jnp.sum(jnp.tanh(acc[batch:batch + 1, :]))
        klb_step = jnp.sum(0.5 * (-blv + e_b * e_b + bmu * bmu - 1.0))
        part_ref[...] += (jnp.where(lane == 1, cw_sum, 0.0)
                          + jnp.where(lane == 2, klb_step, 0.0))


def mnf_linear_pallas(x, weight_mu, weight_logstd, eps_weight, z,
                      bias_mu, bias_logvar, eps_bias, rzero_c, *,
                      threshold_var=0.5, block_out=512, block_in=1024,
                      param_dtype=jnp.bfloat16):
    """Returns (out, kldiv_weight, kldiv_bias, mean(tanh(rzero_c @ W.T)))."""
    f32 = jnp.float32
    B, din = x.shape
    dout = weight_mu.shape[0]

    TK = min(block_in, _round_up(din, 128))
    TO = min(block_out, _round_up(dout, 128))
    din_p = _round_up(din, TK)
    dout_p = _round_up(dout, TO)
    n_i, n_k = dout_p // TO, din_p // TK
    Ba = B + 1                                 # batch rows + one rzero_c row

    def pad2(a, rows, cols, dt):
        a = a.astype(dt)
        return jnp.pad(a, ((0, rows - a.shape[0]), (0, cols - a.shape[1])))

    # Zero padding keeps every fused reduction exact:
    #   logstd=0, eps=0, mu=0  ->  weight=0 and its KL contribution is 0.
    x_aug = jnp.concatenate(
        [x.astype(f32), rzero_c.reshape(1, din).astype(f32)], axis=0)
    x_aug = pad2(x_aug, Ba, din_p, f32)
    wmu_p = pad2(weight_mu, dout_p, din_p, param_dtype)
    wls_p = pad2(weight_logstd, dout_p, din_p, param_dtype)
    eps_p = pad2(eps_weight, dout_p, din_p, param_dtype)
    z_p = pad2(z.reshape(1, din), 1, din_p, f32)
    bmu_p = pad2(bias_mu.reshape(1, dout), 1, dout_p, f32)
    blv_p = pad2(bias_logvar.reshape(1, dout), 1, dout_p, f32)
    beps_p = pad2(eps_bias.reshape(1, dout), 1, dout_p, f32)

    # VMEM budget (double-buffered inputs/outputs + accumulator scratch);
    # raise the scoped limit only when the default would be tight.
    itemsize = jnp.asarray(0, param_dtype).dtype.itemsize
    vmem_need = (2 * (Ba * TK * 4 + 3 * TO * TK * itemsize + TK * 4 + 3 * TO * 4)
                 + 2 * (B * TO * 4 + 8 * 128 * 4)
                 + Ba * TO * 4)
    vmem_limit = None
    if vmem_need > 12 * 1024 * 1024:
        vmem_limit = int(min(vmem_need + (4 << 20), 96 * 1024 * 1024))

    kernel = functools.partial(_mnf_linear_kernel,
                               threshold_var=float(threshold_var), batch=B)
    w_spec = pl.BlockSpec((TO, TK), lambda i, k: (i, k))
    col_spec = pl.BlockSpec((1, TO), lambda i, k: (0, i))

    out, part = pl.pallas_call(
        kernel,
        grid=(n_i, n_k),
        in_specs=[
            pl.BlockSpec((Ba, TK), lambda i, k: (0, k)),        # x ++ rzero_c
            w_spec, w_spec, w_spec,                             # w mu/logstd/eps
            pl.BlockSpec((1, TK), lambda i, k: (0, k)),         # z
            col_spec, col_spec, col_spec,                       # bias mu/logvar/eps
        ],
        out_specs=[
            pl.BlockSpec((B, TO), lambda i, k: (0, i)),         # out
            pl.BlockSpec((1, 8, 128), lambda i, k: (i, 0, 0)),  # scalar partials
        ],
        out_shape=[
            jax.ShapeDtypeStruct((B, dout_p), f32),
            jax.ShapeDtypeStruct((n_i, 8, 128), f32),
        ],
        scratch_shapes=[pltpu.VMEM((Ba, TO), f32)],
        compiler_params=pltpu.CompilerParams(
            dimension_semantics=("parallel", "arbitrary"),
            vmem_limit_bytes=vmem_limit),
    )(x_aug, wmu_p, wls_p, eps_p, z_p, bmu_p, blv_p, beps_p)

    kldiv_weight = jnp.sum(part[:, 0, 0])
    cw_mean = jnp.sum(part[:, 0, 1]) / dout
    kldiv_bias = jnp.sum(part[:, 0, 2])
    return out[:, :dout], kldiv_weight, kldiv_bias, cw_mean


# --------------------- MaskedNVPFlow (plain JAX glue) ------------------------
# TODO(synk): MaskedNVPFlow source not provided with the module; implemented
# per the standard MNF (Louizos & Welling 2017) masked RealNVP convention.
def init_flow(key, features, hidden_dim, n_hidden, n_flows, scale=0.1):
    flows = []
    for f in range(n_flows):
        k = jax.random.fold_in(key, f)
        ks = jax.random.split(k, 2 * (n_hidden + 3))
        dims = [features] + [hidden_dim] * (n_hidden + 1)
        ki = 0
        hidden_layers = []
        for li in range(n_hidden + 1):
            W = scale * jax.random.normal(ks[ki], (dims[li], dims[li + 1])); ki += 1
            b = scale * jax.random.normal(ks[ki], (dims[li + 1],)); ki += 1
            hidden_layers.append((W, b))
        Wmu = scale * jax.random.normal(ks[ki], (hidden_dim, features)); ki += 1
        bmu = scale * jax.random.normal(ks[ki], (features,)); ki += 1
        Wsig = scale * jax.random.normal(ks[ki], (hidden_dim, features)); ki += 1
        bsig = scale * jax.random.normal(ks[ki], (features,)); ki += 1
        mask = (jnp.arange(features) % 2 == (f % 2)).astype(jnp.float32)
        flows.append((hidden_layers, Wmu, bmu, Wsig, bsig, mask))
    return flows


def apply_flow(flows, z):
    logdets = jnp.float32(0.0)
    for hidden_layers, Wmu, bmu, Wsig, bsig, mask in flows:
        h = z * mask
        for W, b in hidden_layers:
            h = jnp.tanh(h @ W + b)
        mu = h @ Wmu + bmu
        sigma = jax.nn.sigmoid(h @ Wsig + bsig)
        z = z * mask + (1.0 - mask) * (z * sigma + (1.0 - sigma) * mu)
        logdets = logdets + jnp.sum((1.0 - mask) * jnp.log(sigma))
    return z, logdets


# --------------------------------- main --------------------------------------
if __name__ == "__main__":
    in_features, out_features = 32, 16
    hidden_dim, n_hidden = 16, 1
    n_flows_q, n_flows_r = 2, 2
    threshold_var = 0.5
    batch = 8

    key = jax.random.PRNGKey(0)
    keys = jax.random.split(key, 16)
    in_stdv = (4.0 / in_features) ** 0.5
    out_stdv = (4.0 / out_features) ** 0.5
    stdv2 = (4.0 / (in_features + out_features)) ** 0.5

    # deterministic parameter init mirroring reset_parameters()
    weight_mu = stdv2 * jax.random.normal(keys[0], (out_features, in_features))
    weight_logstd = -9.0 + 0.001 * stdv2 * jax.random.normal(
        keys[1], (out_features, in_features))
    bias_mu = jnp.zeros((out_features,), jnp.float32)
    bias_logvar = -9.0 + 0.001 * out_stdv * jax.random.normal(
        keys[2], (out_features,))
    qzero_mu = in_stdv * jax.random.normal(keys[3], (in_features,))
    qzero_logvar = jnp.log(0.1) + 0.001 * in_stdv * jax.random.normal(
        keys[4], (in_features,))
    rzero_c = in_stdv * jax.random.normal(keys[5], (in_features,))
    r_zero_b1 = in_stdv * jax.random.normal(keys[6], (in_features,))
    r_zero_b2 = in_stdv * jax.random.normal(keys[7], (in_features,))

    # deterministic noise buffers mirroring reset_noise()
    epsilon_z = jax.random.normal(keys[8], (in_features,))
    epsilon_weight = jax.random.normal(keys[9], (out_features, in_features))
    epsilon_bias = jax.random.normal(keys[10], (out_features,))

    flow_q = init_flow(keys[11], in_features, hidden_dim, n_hidden, n_flows_q)
    flow_r = init_flow(keys[12], in_features, hidden_dim, n_hidden, n_flows_r)

    x = jax.random.normal(keys[13], (batch, in_features))

    # -------- forward pass (training=True, kl=True) --------
    # sample_z: z0 = qzero_mu + exp(0.5*logvar)*eps ; z, logdets = flow_q(z0)
    qzero_std = jnp.exp(0.5 * qzero_logvar)
    z0 = qzero_mu + qzero_std * epsilon_z
    z, logdets = apply_flow(flow_q, z0)

    # hot path in Pallas: weight+bias sampling, linear, weight/bias KL, cw mean
    out, kldiv_weight, kldiv_bias, cw_mean = mnf_linear_pallas(
        x, weight_mu, weight_logstd, epsilon_weight, z,
        bias_mu, bias_logvar, epsilon_bias, rzero_c,
        threshold_var=threshold_var)

    # remaining KL glue (in_features-sized vectors)
    logq = -0.5 * jnp.sum(qzero_logvar) - logdets
    mu_tilde = r_zero_b1 * cw_mean             # == mean(b1.ger(cw), dim=1)
    neg_log_var_tilde = r_zero_b2 * cw_mean    # == mean(b2.ger(cw), dim=1)
    z_r, logr = apply_flow(flow_r, z)
    logr = logr + 0.5 * jnp.sum(
        -jnp.exp(neg_log_var_tilde) * (z_r - mu_tilde) ** 2 + neg_log_var_tilde)
    kldiv = kldiv_weight + kldiv_bias + logq - logr

    # -------- pure-JAX references --------
    def reference(wmu_r, wls_r, epsw_r):
        w = z[None, :] * wmu_r + jnp.minimum(jnp.exp(wls_r), threshold_var) * epsw_r
        b = bias_mu + jnp.minimum(jnp.exp(0.5 * bias_logvar),
                                  threshold_var) * epsilon_bias
        o = x @ w.T + b[None, :]
        klw = 0.5 * jnp.sum(-2.0 * wls_r + jnp.exp(2.0 * wls_r)
                            + (z[None, :] * wmu_r) ** 2 - 1.0)
        klb = 0.5 * jnp.sum(-bias_logvar + jnp.exp(bias_logvar)
                            + bias_mu * bias_mu - 1.0)
        cwm = jnp.mean(jnp.tanh(rzero_c @ w.T))
        return o, klw, klb, cwm

    bf = jnp.bfloat16
    # same math as the kernel (bf16-stored weight params, f32 compute)
    o_q, klw_q, klb_q, cwm_q = reference(
        weight_mu.astype(bf).astype(jnp.float32),
        weight_logstd.astype(bf).astype(jnp.float32),
        epsilon_weight.astype(bf).astype(jnp.float32))
    # original full-f32 module semantics (bf16 storage perturbs this slightly)
    o_f, klw_f, klb_f, cwm_f = reference(weight_mu, weight_logstd, epsilon_weight)

    jax.block_until_ready((out, kldiv))
    assert jnp.allclose(out, o_q, rtol=1e-3, atol=1e-3)
    assert jnp.allclose(kldiv_weight, klw_q, rtol=1e-3, atol=1e-3)
    assert jnp.allclose(kldiv_bias, klb_q, rtol=1e-3, atol=1e-3)
    assert jnp.allclose(cw_mean, cwm_q, rtol=1e-3, atol=1e-3)
    assert jnp.allclose(out, o_f, rtol=5e-2, atol=5e-2)
    assert jnp.allclose(kldiv_weight, klw_f, rtol=5e-2, atol=5e-2)
    assert jnp.allclose(cw_mean, cwm_f, rtol=5e-2, atol=5e-2)
    print("KERNEL_OK")
</pallas_src>

<mosaic_0001>
module attributes {stable_mosaic.version = 11 : i64} {
  func.func @_mnf_linear_kernel(%arg0: i32, %arg1: i32, %arg2: memref<9x128xf32, #tpu.memory_space<vmem>>, %arg3: memref<128x128xbf16, #tpu.memory_space<vmem>>, %arg4: memref<128x128xbf16, #tpu.memory_space<vmem>>, %arg5: memref<128x128xbf16, #tpu.memory_space<vmem>>, %arg6: memref<1x128xf32, #tpu.memory_space<vmem>>, %arg7: memref<1x128xf32, #tpu.memory_space<vmem>>, %arg8: memref<1x128xf32, #tpu.memory_space<vmem>>, %arg9: memref<1x128xf32, #tpu.memory_space<vmem>>, %arg10: memref<8x128xf32, #tpu.memory_space<vmem>>, %arg11: memref<1x8x128xf32, #tpu.memory_space<vmem>>, %arg12: memref<9x128xf32, #tpu.memory_space<vmem>>) attributes {dimension_semantics = [#tpu.dimension_semantics<parallel>, #tpu.dimension_semantics<arbitrary>], iteration_bounds = array<i64: 1, 1>, scalar_prefetch = 0 : i64, scratch_operands = 1 : i64, tpu.core_type = #tpu.core_type<tc>, window_params = [{transform_indices = @transform_0, window_bounds = array<i64: 9, 128>}, {transform_indices = @transform_1, window_bounds = array<i64: 128, 128>}, {transform_indices = @transform_2, window_bounds = array<i64: 128, 128>}, {transform_indices = @transform_3, window_bounds = array<i64: 128, 128>}, {transform_indices = @transform_4, window_bounds = array<i64: 1, 128>}, {transform_indices = @transform_5, window_bounds = array<i64: 1, 128>}, {transform_indices = @transform_6, window_bounds = array<i64: 1, 128>}, {transform_indices = @transform_7, window_bounds = array<i64: 1, 128>}, {transform_indices = @transform_8, window_bounds = array<i64: 8, 128>}, {transform_indices = @transform_9, window_bounds = array<i64: 1, 8, 128>}]} {
    %c0_i32 = arith.constant 0 : i32
    %0 = arith.cmpi eq, %arg1, %c0_i32 : i32
    %1 = arith.extui %0 : i1 to i32
    %c0_i32_0 = arith.constant 0 : i32
    %2 = arith.cmpi ne, %1, %c0_i32_0 : i32
    scf.if %2 {
      %cst_29 = arith.constant 0.000000e+00 : f32
      %48 = vector.broadcast %cst_29 : f32 to vector<9x128xf32>
      %c0_30 = arith.constant 0 : index
      %c0_31 = arith.constant 0 : index
      %49 = vector.load %arg12[%c0_30, %c0_31] : memref<9x128xf32, #tpu.memory_space<vmem>>, vector<9x128xf32>
      tpu.vector_store %arg12[%c0_30, %c0_31], %48 {strides = array<i32>} : memref<9x128xf32, #tpu.memory_space<vmem>>, vector<9x128xf32>,
      %cst_32 = arith.constant 0.000000e+00 : f32
      %50 = vector.broadcast %cst_32 : f32 to vector<1x8x128xf32>
      %c0_33 = arith.constant 0 : index
      %c0_34 = arith.constant 0 : index
      %c0_35 = arith.constant 0 : index
      %51 = vector.load %arg11[%c0_33, %c0_34, %c0_35] : memref<1x8x128xf32, #tpu.memory_space<vmem>>, vector<1x8x128xf32>
      tpu.vector_store %arg11[%c0_33, %c0_34, %c0_35], %50 {strides = array<i32>} : memref<1x8x128xf32, #tpu.memory_space<vmem>>, vector<1x8x128xf32>,
    } else {
    }
    %c0 = arith.constant 0 : index
    %c0_1 = arith.constant 0 : index
    %3 = vector.load %arg6[%c0, %c0_1] : memref<1x128xf32, #tpu.memory_space<vmem>>, vector<1x128xf32>
    %c0_2 = arith.constant 0 : index
    %c0_3 = arith.constant 0 : index
    %4 = vector.load %arg3[%c0_2, %c0_3] : memref<128x128xbf16, #tpu.memory_space<vmem>>, vector<128x128xbf16>
    %5 = arith.extf %4 : vector<128x128xbf16> to vector<128x128xf32>
    %c0_4 = arith.constant 0 : index
    %c0_5 = arith.constant 0 : index
    %6 = vector.load %arg4[%c0_4, %c0_5] : memref<128x128xbf16, #tpu.memory_space<vmem>>, vector<128x128xbf16>
    %7 = arith.extf %6 : vector<128x128xbf16> to vector<128x128xf32>
    %c0_6 = arith.constant 0 : index
    %c0_7 = arith.constant 0 : index
    %8 = vector.load %arg5[%c0_6, %c0_7] : memref<128x128xbf16, #tpu.memory_space<vmem>>, vector<128x128xbf16>
    %9 = arith.extf %8 : vector<128x128xbf16> to vector<128x128xf32>
    %10 = math.exp %7 : vector<128x128xf32>
    %11 = vector.broadcast %3 : vector<1x128xf32> to vector<128x128xf32>
    %12 = arith.mulf %11, %5 : vector<128x128xf32>
    %cst = arith.constant 5.000000e-01 : f32
    %13 = vector.broadcast %cst : f32 to vector<128x128xf32>
    %14 = arith.minimumf %10, %13 : vector<128x128xf32>
    %15 = arith.mulf %14, %9 : vector<128x128xf32>
    %16 = arith.addf %12, %15 : vector<128x128xf32>
    %c0_8 = arith.constant 0 : index
    %c0_9 = arith.constant 0 : index
    %17 = vector.load %arg2[%c0_8, %c0_9] : memref<9x128xf32, #tpu.memory_space<vmem>>, vector<9x128xf32>
    %c0_10 = arith.constant 0 : index
    %c0_11 = arith.constant 0 : index
    %18 = vector.load %arg12[%c0_10, %c0_11] : memref<9x128xf32, #tpu.memory_space<vmem>>, vector<9x128xf32>
    %cst_12 = arith.constant dense<0.000000e+00> : vector<9x128xf32>
    %19 = tpu.matmul %17, %16, %cst_12 {dimension_numbers = #tpu.dot_dimension_numbers<[1], [1], [0], [0], [0, 0, 1, 0], [], []>} : vector<9x128xf32>, vector<128x128xf32>, vector<9x128xf32> -> vector<9x128xf32>
    %20 = arith.addf %18, %19 : vector<9x128xf32>
    %c0_13 = arith.constant 0 : index
    %c0_14 = arith.constant 0 : index
    %21 = vector.load %arg12[%c0_13, %c0_14] : memref<9x128xf32, #tpu.memory_space<vmem>>, vector<9x128xf32>
    tpu.vector_store %arg12[%c0_13, %c0_14], %20 {strides = array<i32>} : memref<9x128xf32, #tpu.memory_space<vmem>>, vector<9x128xf32>,
    %cst_15 = arith.constant -2.000000e+00 : f32
    %22 = vector.broadcast %cst_15 : f32 to vector<128x128xf32>
    %23 = arith.mulf %22, %7 : vector<128x128xf32>
    %24 = arith.mulf %10, %10 : vector<128x128xf32>
    %25 = arith.addf %23, %24 : vector<128x128xf32>
    %26 = arith.mulf %12, %12 : vector<128x128xf32>
    %27 = arith.addf %25, %26 : vector<128x128xf32>
    %cst_16 = arith.constant 1.000000e+00 : f32
    %28 = vector.broadcast %cst_16 : f32 to vector<128x128xf32>
    %29 = arith.subf %27, %28 : vector<128x128xf32>
    %cst_17 = arith.constant 5.000000e-01 : f32
    %30 = vector.broadcast %cst_17 : f32 to vector<128x128xf32>
    %31 = arith.mulf %30, %29 : vector<128x128xf32>
    %32 = vector.shape_cast %31 : vector<128x128xf32> to vector<1x128x128xf32>
    %cst_18 = arith.constant dense<0.000000e+00> : vector<1xf32>
    %33 = vector.multi_reduction <add>, %32, %cst_18 [1, 2] : vector<1x128x128xf32> to vector<1xf32>
    %34 = vector.shape_cast %33 : vector<1xf32> to vector<1x1x1xf32>
    %35 = vector.extract %34[0, 0, 0] : f32 from vector<1x1x1xf32>
    %36 = tpu.iota {dimensions = array<i32: 2>} : vector<1x8x128xi32>
    %c0_19 = arith.constant 0 : index
    %c0_20 = arith.constant 0 : index
    %c0_21 = arith.constant 0 : index
    %37 = vector.load %arg11[%c0_19, %c0_20, %c0_21] : memref<1x8x128xf32, #tpu.memory_space<vmem>>, vector<1x8x128xf32>
    %c0_i32_22 = arith.constant 0 : i32
    %38 = vector.broadcast %c0_i32_22 : i32 to vector<1x8x128xi32>
    %39 = arith.cmpi eq, %36, %38 : vector<1x8x128xi32>
    %cst_23 = arith.constant 0.000000e+00 : f32
    %40 = vector.broadcast %35 : f32 to vector<1x8x128xf32>
    %41 = vector.broadcast %cst_23 : f32 to vector<1x8x128xf32>
    %42 = arith.select %39, %40, %41 : vector<1x8x128xi1>, vector<1x8x128xf32>
    %43 = arith.addf %37, %42 : vector<1x8x128xf32>
    %c0_24 = arith.constant 0 : index
    %c0_25 = arith.constant 0 : index
    %c0_26 = arith.constant 0 : index
    %44 = vector.load %arg11[%c0_24, %c0_25, %c0_26] : memref<1x8x128xf32, #tpu.memory_space<vmem>>, vector<1x8x128xf32>
    tpu.vector_store %arg11[%c0_24, %c0_25, %c0_26], %43 {strides = array<i32>} : memref<1x8x128xf32, #tpu.memory_space<vmem>>, vector<1x8x128xf32>,
    %c0_i32_27 = arith.constant 0 : i32
    %45 = arith.cmpi eq, %arg1, %c0_i32_27 : i32
    %46 = arith.extui %45 : i1 to i32
    %c0_i32_28 = arith.constant 0 : i32
    %47 = arith.cmpi ne, %46, %c0_i32_28 : i32
    scf.if %47 {
      %c0_29 = arith.constant 0 : index
      %c0_30 = arith.constant 0 : index
      %48 = vector.load %arg12[%c0_29, %c0_30] : memref<9x128xf32, #tpu.memory_space<vmem>>, vector<9x128xf32>
      %c0_31 = arith.constant 0 : index
      %c0_32 = arith.constant 0 : index
      %49 = vector.load %arg7[%c0_31, %c0_32] : memref<1x128xf32, #tpu.memory_space<vmem>>, vector<1x128xf32>
      %c0_33 = arith.constant 0 : index
      %c0_34 = arith.constant 0 : index
      %50 = vector.load %arg8[%c0_33, %c0_34] : memref<1x128xf32, #tpu.memory_space<vmem>>, vector<1x128xf32>
      %cst_35 = arith.constant 5.000000e-01 : f32
      %51 = vector.broadcast %cst_35 : f32 to vector<1x128xf32>
      %52 = arith.mulf %51, %50 : vector<1x128xf32>
      %53 = math.exp %52 : vector<1x128xf32>
      %cst_36 = arith.constant 5.000000e-01 : f32
      %54 = vector.broadcast %cst_36 : f32 to vector<1x128xf32>
      %55 = arith.minimumf %53, %54 : vector<1x128xf32>
      %c0_37 = arith.constant 0 : index
      %c0_38 = arith.constant 0 : index
      %56 = vector.load %arg9[%c0_37, %c0_38] : memref<1x128xf32, #tpu.memory_space<vmem>>, vector<1x128xf32>
      %57 = arith.mulf %55, %56 : vector<1x128xf32>
      %58 = arith.addf %49, %57 : vector<1x128xf32>
      %59 = vector.extract_strided_slice %48 {offsets = [0, 0], sizes = [8, 128], strides = [1, 1]} : vector<9x128xf32> to vector<8x128xf32>
      %60 = vector.broadcast %58 : vector<1x128xf32> to vector<8x128xf32>
      %61 = arith.addf %59, %60 : vector<8x128xf32>
      %c0_39 = arith.constant 0 : index
      %c0_40 = arith.constant 0 : index
      %62 = vector.load %arg10[%c0_39, %c0_40] : memref<8x128xf32, #tpu.memory_space<vmem>>, vector<8x128xf32>
      tpu.vector_store %arg10[%c0_39, %c0_40], %61 {strides = array<i32>} : memref<8x128xf32, #tpu.memory_space<vmem>>, vector<8x128xf32>,
      %63 = vector.extract_strided_slice %48 {offsets = [8, 0], sizes = [1, 128], strides = [1, 1]} : vector<9x128xf32> to vector<1x128xf32>
      %64 = math.tanh %63 : vector<1x128xf32>
      %65 = vector.shape_cast %64 : vector<1x128xf32> to vector<1x1x128xf32>
      %cst_41 = arith.constant dense<0.000000e+00> : vector<1xf32>
      %66 = vector.multi_reduction <add>, %65, %cst_41 [1, 2] : vector<1x1x128xf32> to vector<1xf32>
      %67 = vector.shape_cast %66 : vector<1xf32> to vector<1x1x1xf32>
      %68 = vector.extract %67[0, 0, 0] : f32 from vector<1x1x1xf32>
      %cst_42 = arith.constant 0.000000e+00 : f32
      %69 = vector.broadcast %cst_42 : f32 to vector<1x128xf32>
      %70 = arith.subf %69, %50 : vector<1x128xf32>
      %71 = arith.mulf %53, %53 : vector<1x128xf32>
      %72 = arith.addf %70, %71 : vector<1x128xf32>
      %73 = arith.mulf %49, %49 : vector<1x128xf32>
      %74 = arith.addf %72, %73 : vector<1x128xf32>
      %cst_43 = arith.constant 1.000000e+00 : f32
      %75 = vector.broadcast %cst_43 : f32 to vector<1x128xf32>
      %76 = arith.subf %74, %75 : vector<1x128xf32>
      %cst_44 = arith.constant 5.000000e-01 : f32
      %77 = vector.broadcast %cst_44 : f32 to vector<1x128xf32>
      %78 = arith.mulf %77, %76 : vector<1x128xf32>
      %79 = vector.shape_cast %78 : vector<1x128xf32> to vector<1x1x128xf32>
      %cst_45 = arith.constant dense<0.000000e+00> : vector<1xf32>
      %80 = vector.multi_reduction <add>, %79, %cst_45 [1, 2] : vector<1x1x128xf32> to vector<1xf32>
      %81 = vector.shape_cast %80 : vector<1xf32> to vector<1x1x1xf32>
      %82 = vector.extract %81[0, 0, 0] : f32 from vector<1x1x1xf32>
      %c0_46 = arith.constant 0 : index
      %c0_47 = arith.constant 0 : index
      %c0_48 = arith.constant 0 : index
      %83 = vector.load %arg11[%c0_46, %c0_47, %c0_48] : memref<1x8x128xf32, #tpu.memory_space<vmem>>, vector<1x8x128xf32>
      %c1_i32 = arith.constant 1 : i32
      %84 = vector.broadcast %c1_i32 : i32 to vector<1x8x128xi32>
      %85 = arith.cmpi eq, %36, %84 : vector<1x8x128xi32>
      %cst_49 = arith.constant 0.000000e+00 : f32
      %86 = vector.broadcast %68 : f32 to vector<1x8x128xf32>
      %87 = vector.broadcast %cst_49 : f32 to vector<1x8x128xf32>
      %88 = arith.select %85, %86, %87 : vector<1x8x128xi1>, vector<1x8x128xf32>
      %c2_i32 = arith.constant 2 : i32
      %89 = vector.broadcast %c2_i32 : i32 to vector<1x8x128xi32>
      %90 = arith.cmpi eq, %36, %89 : vector<1x8x128xi32>
      %cst_50 = arith.constant 0.000000e+00 : f32
      %91 = vector.broadcast %82 : f32 to vector<1x8x128xf32>
      %92 = vector.broadcast %cst_50 : f32 to vector<1x8x128xf32>
      %93 = arith.select %90, %91, %92 : vector<1x8x128xi1>, vector<1x8x128xf32>
      %94 = arith.addf %88, %93 : vector<1x8x128xf32>
      %95 = arith.addf %83, %94 : vector<1x8x128xf32>
      %c0_51 = arith.constant 0 : index
      %c0_52 = arith.constant 0 : index
      %c0_53 = arith.constant 0 : index
      %96 = vector.load %arg11[%c0_51, %c0_52, %c0_53] : memref<1x8x128xf32, #tpu.memory_space<vmem>>, vector<1x8x128xf32>
      tpu.vector_store %arg11[%c0_51, %c0_52, %c0_53], %95 {strides = array<i32>} : memref<1x8x128xf32, #tpu.memory_space<vmem>>, vector<1x8x128xf32>,
    } else {
    }
    return
  }
  func.func @transform_0(%arg0: i32, %arg1: i32) -> (i32, i32) {
    %c0_i32 = arith.constant 0 : i32
    %c0_i32_0 = arith.constant 0 : i32
    return %c0_i32, %arg1 : i32, i32
  }
  func.func @transform_1(%arg0: i32, %arg1: i32) -> (i32, i32) {
    %c0_i32 = arith.constant 0 : i32
    return %arg0, %arg1 : i32, i32
  }
  func.func @transform_2(%arg0: i32, %arg1: i32) -> (i32, i32) {
    %c0_i32 = arith.constant 0 : i32
    return %arg0, %arg1 : i32, i32
  }
  func.func @transform_3(%arg0: i32, %arg1: i32) -> (i32, i32) {
    %c0_i32 = arith.constant 0 : i32
    return %arg0, %arg1 : i32, i32
  }
  func.func @transform_4(%arg0: i32, %arg1: i32) -> (i32, i32) {
    %c0_i32 = arith.constant 0 : i32
    %c0_i32_0 = arith.constant 0 : i32
    return %c0_i32, %arg1 : i32, i32
  }
  func.func @transform_5(%arg0: i32, %arg1: i32) -> (i32, i32) {
    %c0_i32 = arith.constant 0 : i32
    %c0_i32_0 = arith.constant 0 : i32
    return %c0_i32, %arg0 : i32, i32
  }
  func.func @transform_6(%arg0: i32, %arg1: i32) -> (i32, i32) {
    %c0_i32 = arith.constant 0 : i32
    %c0_i32_0 = arith.constant 0 : i32
    return %c0_i32, %arg0 : i32, i32
  }
  func.func @transform_7(%arg0: i32, %arg1: i32) -> (i32, i32) {
    %c0_i32 = arith.constant 0 : i32
    %c0_i32_0 = arith.constant 0 : i32
    return %c0_i32, %arg0 : i32, i32
  }
  func.func @transform_8(%arg0: i32, %arg1: i32) -> (i32, i32) {
    %c0_i32 = arith.constant 0 : i32
    %c0_i32_0 = arith.constant 0 : i32
    return %c0_i32, %arg0 : i32, i32
  }
  func.func @transform_9(%arg0: i32, %arg1: i32) -> (i32, i32, i32) {
    %c0_i32 = arith.constant 0 : i32
    %c0_i32_0 = arith.constant 0 : i32
    %c0_i32_1 = arith.constant 0 : i32
    return %arg0, %c0_i32, %c0_i32_0 : i32, i32, i32
  }
}

</mosaic_0001>

<bundles_post_ra>
// kernel: tpu_custom_call.1
= control target key start
LH: loop header
LB: loop body
LE: loop exit
PB: predicated region body
PF: predicated region fallthrough
CT: control target
= control target key end

     0   :  { %15 = vsyncpa [#allocation4], 0  ;;  %s1377_s0 = inlined_call_operand.hbm [shape: f32[9,128], index: 0, kind: input, shape index: {}]   ;;  %s1378_s1 = inlined_call_operand.hbm [shape: bf16[128,128], index: 1, kind: input, shape index: {}]   ;;  %s1379_s2 = inlined_call_operand.hbm [shape: bf16[128,128], index: 2, kind: input, shape index: {}]   ;;  %s1380_s3 = inlined_call_operand.hbm [shape: bf16[128,128], index: 3, kind: input, shape index: {}]   ;;  %s1381_s4 = inlined_call_operand.vmem [shape: f32[1,128], index: 4, kind: input, shape index: {}]   ;;  %s1382_s5 = inlined_call_operand.vmem [shape: f32[1,128], index: 5, kind: input, shape index: {}]   ;;  %s1383_s6 = inlined_call_operand.vmem [shape: f32[1,128], index: 6, kind: input, shape index: {}]   ;;  %s1384_s7 = inlined_call_operand.vmem [shape: f32[1,128], index: 7, kind: input, shape index: {}]   ;;  %s1385_s8 = inlined_call_operand.hbm [shape: f32[8,128], index: 8, kind: output, shape index: {0}]   ;;  %s1386_s9 = inlined_call_operand.hbm [shape: f32[1,8,128], index: 9, kind: output, shape index: {1}]  }
   0x1   :  { %16 = vsyncpa [#allocation7], 0 }
   0x2   :  { %17 = vsyncpa [#allocation10], 0 }
   0x3   :  { %18 = vsyncpa [#allocation5], 0 }
   0x4   :  { %19 = vsyncpa [#allocation13], 0  ;;  %s1028_s30 = smov [#allocation6]   ;;  %s886_s13 = scalar_lea.hbm %s1378_s1, 1024 }
   0x5   :  { %s37_s10 = sshll.u32 %s1028_s30, 4  ;;  %p887_p0 = scmp.ne.s32.totalorder %s1378_s1, %s886_s13  ;;  %s38_s10 = int_to_ptr.vmem [resolvable:$true] %s37_s10 }
   0x6   :  { %p890_p1 = scmp.lt.u32.totalorder %s886_s13, %s1378_s1 }
   0x8   :  { %p892_p2 = pnand %p890_p1, %p887_p0 }
   0xa   :  { %895 = shalt.err (!%p892_p2)
}
   0xb   :  { %s896_s18 = scalar_lea.vmem %s38_s10, 1024  ;;  %p901_p4 = scmp.lt.s32.totalorder %s38_s10, %s38_s10 }
   0xc   :  { %p897_p3 = scmp.ne.s32.totalorder %s38_s10, %s896_s18  ;;  %p902_p5 = scmp.lt.s32.totalorder %s896_s18, %s896_s18 }
   0xe   :  { %p903_p6 = por %p902_p5, %p901_p4 }
  0x10   :  { %p904_p7 = pnand %p903_p6, %p897_p3 }
  0x12   :  { %907 = shalt.err (!%p904_p7)
}
  0x13   :  { %s1029_s19 = smov 64   ;;  %s1030_s20 = smov 4  }
  0x14   :  { %43 = dma.hbm_to_vmem [thread:$0]  %s1378_s1, 1024, %s38_s10, [#allocation7], %s1029_s19, %s1029_s19, %s1030_s20  }
  0x15   :  { %s1031_s23 = smov [#allocation3]   ;;  %s908_s27 = scalar_lea.hbm %s1377_s0, 256 }
  0x16   :  { %s25_s24 = sshll.u32 %s1031_s23, 4  ;;  %p909_p8 = scmp.ne.s32.totalorder %s1377_s0, %s908_s27  ;;  %s26_s24 = int_to_ptr.vmem [resolvable:$true] %s25_s24 }
  0x17   :  { %p912_p9 = scmp.lt.u32.totalorder %s908_s27, %s1377_s0 }
  0x19   :  { %p914_p10 = pnand %p912_p9, %p909_p8 }
  0x1b   :  { %917 = shalt.err (!%p914_p10)
}
  0x1c   :  { %s918_s12 = scalar_lea.vmem %s26_s24, 256  ;;  %p923_p12 = scmp.lt.s32.totalorder %s26_s24, %s26_s24 }
  0x1d   :  { %p919_p11 = scmp.ne.s32.totalorder %s26_s24, %s918_s12  ;;  %p924_p13 = scmp.lt.s32.totalorder %s918_s12, %s918_s12 }
  0x1f   :  { %p925_p0 = por %p924_p13, %p923_p12 }
  0x21   :  { %p926_p1 = pnand %p925_p0, %p919_p11 }
  0x23   :  { %929 = shalt.err (!%p926_p1)
}
  0x24   :  { %s1032_s1 = smov 128   ;;  %s1033_s10 = smov 8  }
  0x25   :  { %31 = dma.hbm_to_vmem [thread:$0]  %s1377_s0, 256, %s26_s24, [#allocation4], %s1032_s1, %s1032_s1, %s1033_s10  }
  0x26   :  { %s1034_s15 = smov [#allocation8]   ;;  %s1035_s17 = smov [#allocation9]  }
  0x27   :  { %s49_s16 = sshll.u32 %s1034_s15, 4  ;;  %s61_s18 = sshll.u32 %s1035_s17, 4  ;;  %s50_s16 = int_to_ptr.vmem [resolvable:$true] %s49_s16  ;;  %s1116_s18 = int_to_ptr.vmem [resolvable:$true] %s61_s18 }
  0x28   :  { %s930_s23 = scalar_lea.hbm %s1379_s2, 1024 }
  0x29   :  { %p931_p2 = scmp.ne.s32.totalorder %s1379_s2, %s930_s23  ;;  %p934_p3 = scmp.lt.u32.totalorder %s930_s23, %s1379_s2 }
  0x2b   :  { %p936_p4 = pnand %p934_p3, %p931_p2 }
  0x2d   :  { %939 = shalt.err (!%p936_p4)
}
  0x2e   :  { %s940_s0 = scalar_lea.vmem %s50_s16, 1024  ;;  %p945_p6 = scmp.lt.s32.totalorder %s50_s16, %s50_s16 }
  0x2f   :  { %p941_p5 = scmp.ne.s32.totalorder %s50_s16, %s940_s0  ;;  %p946_p7 = scmp.lt.s32.totalorder %s940_s0, %s940_s0 }
  0x31   :  { %p947_p8 = por %p946_p7, %p945_p6 }
  0x33   :  { %p948_p9 = pnand %p947_p8, %p941_p5 }
  0x35   :  { %951 = shalt.err (!%p948_p9)
}
  0x36   :  { %55 = dma.hbm_to_vmem [thread:$0]  %s1379_s2, 1024, %s50_s16, [#allocation7], %s1029_s19, %s1029_s19, %s1030_s20  }
  0x37   :  { %s952_s12 = scalar_lea.hbm %s1380_s3, 1024 }
  0x38   :  { %p953_p10 = scmp.ne.s32.totalorder %s1380_s3, %s952_s12  ;;  %p956_p11 = scmp.lt.u32.totalorder %s952_s12, %s1380_s3 }
  0x3a   :  { %p958_p12 = pnand %p956_p11, %p953_p10 }
  0x3c   :  { %961 = shalt.err (!%p958_p12)
}
  0x3d   :  { %s962_s15 = scalar_lea.vmem %s1116_s18, 1024  ;;  %p967_p0 = scmp.lt.s32.totalorder %s1116_s18, %s1116_s18 }
  0x3e   :  { %p963_p13 = scmp.ne.s32.totalorder %s1116_s18, %s962_s15  ;;  %p968_p1 = scmp.lt.s32.totalorder %s962_s15, %s962_s15 }
  0x40   :  { %p969_p2 = por %p968_p1, %p967_p0 }
  0x42   :  { %p970_p3 = pnand %p969_p2, %p963_p13 }
  0x44   :  { %973 = shalt.err (!%p970_p3)
}
  0x45   :  { %67 = dma.hbm_to_vmem [thread:$0]  %s1380_s3, 1024, %s1116_s18, [#allocation10], %s1029_s19, %s1029_s19, %s1030_s20  }
  0x46   :  { %1018 = dma.done.wait [#allocation4], 256  }
  0x47   :  { %1019 = vsyncadd [#allocation4], 4294967040 }
  0x48   :  { %1020 = dma.done.wait [#allocation7], 2048  }
  0x49   :  { %1021 = vsyncadd [#allocation7], 4294965248 }
  0x4a   :  { %1022 = dma.done.wait [#allocation10], 1024  }
  0x4b   :  { %1023 = vsyncadd [#allocation10], 4294966272  ;;  %v1036_v0 = vmov 0.0   ;;  %v1156_v1 = vld [vmem:[%s1381_s4] ss:$0 sm:$0xff]  ;;  %v727_v9 = vld [vmem:[#allocation6 + $0x8] sm:$0xff]  }
  0x4c   :  { %93 = vst [vmem:[#allocation2 + $0x8] sm:$0x1] %v1036_v0  ;;  %v632_v2 = vld [vmem:[#allocation6] sm:$0xff]   ;;  %v734_v10 = vld [vmem:[#allocation8 + $0x8] sm:$0xff]   ;;  %v637_v12 = vunpack.c.l.bf16 %v727_v9  ;;  %v638_v16 = vunpack.c.h.bf16 %v727_v9  ;;  %v728_v25 = vld [vmem:[#allocation6 + $0x10] sm:$0xff]   ;;  %vm544_vm0 = vcmask 1040384  }
  0x4d   :  { %v664_v3 = vld [vmem:[#allocation8] sm:$0xff]   ;;  %v633_v4 = vunpack.c.l.bf16 %v632_v2  ;;  %v634_v5 = vunpack.c.h.bf16 %v632_v2  ;;  %v669_v19 = vunpack.c.l.bf16 %v734_v10  ;;  %v670_v20 = vunpack.c.h.bf16 %v734_v10  ;;  %v1168_v21 = vld [vmem:[#allocation9 + $0x8] sm:$0xff]   ;;  %v735_v26 = vld [vmem:[#allocation8 + $0x10] sm:$0xff]  }
  0x4e   :  { %v665_v6 = vunpack.c.l.bf16 %v664_v3  ;;  %v666_v7 = vunpack.c.h.bf16 %v664_v3  ;;  %v1158_v8 = vld [vmem:[#allocation9] sm:$0xff]   ;;  %v701_v30 = vunpack.c.l.bf16 %v1168_v21  ;;  %v702_v31 = vunpack.c.h.bf16 %v1168_v21  ;;  %v1190_v34 = vld [vmem:[#allocation9 + $0x10] sm:$0xff]   ;;  %v729_v41 = vld [vmem:[#allocation6 + $0x18] sm:$0xff]  }
  0x4f   :  { %v697_v11 = vunpack.c.l.bf16 %v1158_v8  ;;  %v1162_v15 = vmul.f32 %v633_v4, %v1156_v1  ;;  %v698_v17 = vunpack.c.h.bf16 %v1158_v8  ;;  %v1166_v18 = vmul.f32 %v634_v5, %v1156_v1  ;;  %v294_v42 = vld [vmem:[#allocation3] sm:$0xff]  ;;  %v736_v47 = vld [vmem:[#allocation8 + $0x18] sm:$0xff]  }
  0x50   :  { %v192_v13 = vmul.f32 1.442695, %v665_v6  ;;  %v194_v14 = vmul.f32 1.442695, %v666_v7  ;;  %v1170_v22 = vmul.f32 -2.0, %v665_v6  ;;  %v1172_v23 = vmul.f32 -2.0, %v666_v7  ;;  %798 = vmatprep.mubr.f32.mxu0 %v294_v42 }
  0x51   :  { %v1176_v24 = vmul.f32 %v1162_v15, %v1162_v15  ;;  %v1180_v27 = vmul.f32 %v1166_v18, %v1166_v18  ;;  %v196_v28 = vmul.f32 1.442695, %v669_v19  ;;  %v198_v29 = vmul.f32 1.442695, %v670_v20  ;;  %v1210_v52 = vld [vmem:[#allocation9 + $0x18] sm:$0xff]  }
  0x52   :  { %850 = vpow2.f32 %v192_v13  ;;  %v1185_v32 = vmul.f32 %v637_v12, %v1156_v1  ;;  %v1188_v33 = vmul.f32 %v638_v16, %v1156_v1  ;;  %v641_v35 = vunpack.c.l.bf16 %v728_v25 }
  0x53   :  { %852 = vpow2.f32 %v194_v14  ;;  %v642_v36 = vunpack.c.h.bf16 %v728_v25  ;;  %v673_v37 = vunpack.c.l.bf16 %v735_v26  ;;  %v379_v38 = vmul.f32 -2.0, %v669_v19 }
  0x54   :  { %854 = vpow2.f32 %v196_v28  ;;  %v1192_v39 = vmul.f32 -2.0, %v670_v20  ;;  %v674_v40 = vunpack.c.h.bf16 %v735_v26  ;;  %v1196_v43 = vmul.f32 %v1185_v32, %v1185_v32 }
  0x55   :  { %856 = vpow2.f32 %v198_v29  ;;  %v1200_v44 = vmul.f32 %v1188_v33, %v1188_v33  ;;  %v705_v45 = vunpack.c.l.bf16 %v1190_v34  ;;  %v200_v46 = vmul.f32 1.442695, %v673_v37 }
  0x56   :  { %v706_v48 = vunpack.c.h.bf16 %v1190_v34  ;;  %v202_v49 = vmul.f32 1.442695, %v674_v40  ;;  %v1205_v50 = vmul.f32 %v641_v35, %v1156_v1  ;;  %v1208_v51 = vmul.f32 %v642_v36, %v1156_v1 }
  0x57   :  { %858 = vpow2.f32 %v200_v46  ;;  %v1212_v53 = vmul.f32 -2.0, %v673_v37  ;;  %v645_v54 = vunpack.c.l.bf16 %v729_v41  ;;  %v646_v55 = vunpack.c.h.bf16 %v729_v41  ;;  %v1250_v37 = vld [vmem:[#allocation8 + $0x20] sm:$0xff]  }
  0x58   :  { %860 = vpow2.f32 %v202_v49  ;;  %v1214_v56 = vmul.f32 -2.0, %v674_v40  ;;  %v677_v57 = vunpack.c.l.bf16 %v736_v47  ;;  %v678_v58 = vunpack.c.h.bf16 %v736_v47 }
  0x59   :  { %v1218_v59 = vmul.f32 %v1205_v50, %v1205_v50  ;;  %v1222_v60 = vmul.f32 %v1208_v51, %v1208_v51  ;;  %v709_v61 = vunpack.c.l.bf16 %v1210_v52  ;;  %v710_v62 = vunpack.c.h.bf16 %v1210_v52 }
  0x5a   :  { %v204_v0 = vmul.f32 1.442695, %v677_v57  ;;  %v206_v2 = vmul.f32 1.442695, %v678_v58  ;;  %v1227_v3 = vmul.f32 %v645_v54, %v1156_v1  ;;  %v1230_v4 = vmul.f32 %v646_v55, %v1156_v1 }
  0x5b   :  { %v1232_v9 = vmul.f32 -2.0, %v677_v57  ;;  %v1234_v10 = vmul.f32 -2.0, %v678_v58 }
  0x5c   :  { %v851_v63 = vpop.eup %850  ;;  %862 = vpow2.f32 %v204_v0  ;;  %v1238_v14 = vmul.f32 %v1227_v3, %v1227_v3  ;;  %v1245_v25 = vmul.f32 %v1230_v4, %v1230_v4 }
  0x5d   :  { %v853_v5 = vpop.eup %852  ;;  %v246_v6 = vmin.f32 %v851_v63, 0.5  ;;  %v393_v7 = vmul.f32 %v851_v63, %v851_v63  ;;  %864 = vpow2.f32 %v206_v2 }
  0x5e   :  { %v247_v12 = vmin.f32 %v853_v5, 0.5  ;;  %v394_v13 = vmul.f32 %v853_v5, %v853_v5  ;;  %v855_v16 = vpop.eup %854 }
  0x5f   :  { %v262_v19 = vmul.f32 %v697_v11, %v246_v6  ;;  %v409_v20 = vadd.f32 %v393_v7, %v1170_v22  ;;  %v857_v26 = vpop.eup %856  ;;  %v248_v35 = vmin.f32 %v855_v16, 0.5  ;;  %v395_v36 = vmul.f32 %v855_v16, %v855_v16 }
  0x60   :  { %v263_v28 = vmul.f32 %v698_v17, %v247_v12  ;;  %v410_v29 = vadd.f32 %v394_v13, %v1172_v23  ;;  %v249_v22 = vmin.f32 %v857_v26, 0.5  ;;  %v396_v41 = vmul.f32 %v857_v26, %v857_v26 }
  0x61   :  { %v278_v40 = vadd.f32 %v262_v19, %v1162_v15  ;;  %v441_v11 = vadd.f32 %v1176_v24, %v409_v20  ;;  %v264_v8 = vmul.f32 %v701_v30, %v248_v35  ;;  %v411_v17 = vadd.f32 %v395_v36, %v379_v38  ;;  %v859_v47 = vpop.eup %858 }
  0x62   :  { %v279_v42 = vadd.f32 %v263_v28, %v1166_v18  ;;  %v442_v46 = vadd.f32 %v1180_v27, %v410_v29  ;;  %v265_v49 = vmul.f32 %v702_v31, %v249_v22  ;;  %v412_v54 = vadd.f32 %v396_v41, %v1192_v39  ;;  %v861_v24 = vpop.eup %860 }
  0x63   :  { %v614_v23 = vadd.f32 -1.0, %v441_v11  ;;  %v681_v15 = vunpack.c.l.bf16 %v1250_v37  ;;  %v280_v18 = vadd.f32 %v264_v8, %v1185_v32  ;;  %v443_v27 = vadd.f32 %v1196_v43, %v411_v17 }
  0x64   :  { %v801_v55 = vpack.c.bf16 %v279_v42, %v278_v40  ;;  %v615_v57 = vadd.f32 -1.0, %v442_v46  ;;  %v281_v30 = vadd.f32 %v265_v49, %v1188_v33  ;;  %v444_v38 = vadd.f32 %v1200_v44, %v412_v54 }
  0x65   :  { %v473_v58 = vmul.f32 0.5, %v614_v23  ;;  %v250_v63 = vmin.f32 %v859_v47, 0.5  ;;  %v616_v31 = vadd.f32 -1.0, %v443_v27  ;;  %v251_v0 = vmin.f32 %v861_v24, 0.5  ;;  %v1289_v23 = vld [vmem:[#allocation8 + $0x28] sm:$0xff]  }
  0x66   :  { %802 = vmatprep.subr.bf16.mxu0 %v801_v55  ;;  %v474_v21 = vmul.f32 0.5, %v615_v57  ;;  %v397_v39 = vmul.f32 %v859_v47, %v859_v47  ;;  %v805_v2 = vpack.c.bf16 %v281_v30, %v280_v18  ;;  %v617_v5 = vadd.f32 -1.0, %v444_v38  ;;  %v863_v7 = vpop.eup %862  ;;  %v1293_v57 = vld [vmem:[#allocation8 + $0x30] sm:$0xff]  }
  0x67   :  { %804 = vmatpush3.bf16.xpose.msra.mxu0 %v801_v55  ;;  %v266_v6 = vmul.f32 %v705_v45, %v250_v63  ;;  %v398_v32 = vmul.f32 %v861_v24, %v861_v24  ;;  %v475_v12 = vmul.f32 0.5, %v616_v31  ;;  %v267_v33 = vmul.f32 %v706_v48, %v251_v0  ;;  %v865_v13 = vpop.eup %864  ;;  %v730_v24 = vld [vmem:[#allocation6 + $0x20] sm:$0xff]   ;;  %v1300_v31 = vld [vmem:[#allocation8 + $0x38] sm:$0xff]  }
  0x68   :  { %v489_v43 = vadd.f32 %v474_v21, %v473_v58  ;;  %v413_v44 = vadd.f32 %v397_v39, %v1212_v53  ;;  %806 = vmatprep.subr.bf16.mxu0 %v805_v2  ;;  %v476_v16 = vmul.f32 0.5, %v617_v5  ;;  %v252_v26 = vmin.f32 %v863_v7, 0.5  ;;  %v744_v58 = vld [vmem:[#allocation9 + $0x20] sm:$0xff]  }
  0x69   :  { %v282_v19 = vadd.f32 %v266_v6, %v1205_v50  ;;  %v414_v20 = vadd.f32 %v398_v32, %v1214_v56  ;;  %v283_v45 = vadd.f32 %v267_v33, %v1208_v51  ;;  %v253_v35 = vmin.f32 %v865_v13, 0.5 }
  0x6a   :  { %v490_v28 = vadd.f32 %v489_v43, %v475_v12  ;;  %v445_v29 = vadd.f32 %v1218_v59, %v413_v44  ;;  %v268_v34 = vmul.f32 %v709_v61, %v252_v26  ;;  %v399_v48 = vmul.f32 %v863_v7, %v863_v7 }
  0x6b   :  { %v446_v36 = vadd.f32 %v1222_v60, %v414_v20  ;;  %v400_v53 = vmul.f32 %v865_v13, %v865_v13  ;;  %v809_v11 = vpack.c.bf16 %v283_v45, %v282_v19  ;;  %v269_v50 = vmul.f32 %v710_v62, %v253_v35 }
  0x6c   :  { %v491_v40 = vadd.f32 %v490_v28, %v476_v16  ;;  %v618_v22 = vadd.f32 -1.0, %v445_v29  ;;  %v415_v41 = vadd.f32 %v399_v48, %v1232_v9  ;;  %v682_v42 = vunpack.c.h.bf16 %v1250_v37  ;;  %v745_v28 = vld [vmem:[#allocation9 + $0x28] sm:$0xff]  }
  0x6d   :  { %v619_v56 = vadd.f32 -1.0, %v446_v36  ;;  %v416_v51 = vadd.f32 %v400_v53, %v1234_v10  ;;  %v284_v61 = vadd.f32 %v268_v34, %v1227_v3  ;;  %v285_v52 = vadd.f32 %v269_v50, %v1230_v4 }
  0x6e   :  { %v477_v59 = vmul.f32 0.5, %v618_v22  ;;  %v447_v46 = vadd.f32 %v1238_v14, %v415_v41  ;;  %v208_v62 = vmul.f32 1.442695, %v681_v15  ;;  %v210_v9 = vmul.f32 1.442695, %v682_v42  ;;  %v732_v22 = vld [vmem:[#allocation6 + $0x30] sm:$0xff]  }
  0x6f   :  { %808 = vmatpush3.bf16.xpose.msra.mxu0 %v805_v2  ;;  %v478_v60 = vmul.f32 0.5, %v619_v56  ;;  %v448_v8 = vadd.f32 %v1245_v25, %v416_v51  ;;  %v813_v14 = vpack.c.bf16 %v285_v52, %v284_v61  ;;  %v685_v25 = vunpack.c.l.bf16 %v1289_v23  ;;  %v731_v2 = vld [vmem:[#allocation6 + $0x28] sm:$0xff]  }
  0x70   :  { %810 = vmatprep.subr.bf16.mxu0 %v809_v11  ;;  %v492_v17 = vadd.f32 %v491_v40, %v477_v59  ;;  %v620_v10 = vadd.f32 -1.0, %v447_v46  ;;  %866 = vpow2.f32 %v208_v62  ;;  %v686_v4 = vunpack.c.h.bf16 %v1289_v23  ;;  %v746_v62 = vld [vmem:[#allocation9 + $0x30] sm:$0xff]   ;;  %v532_v23 = vld [vmem:[%s1384_s7] sm:$0x1] }
  0x71   :  { %v621_v47 = vadd.f32 -1.0, %v448_v8  ;;  %868 = vpow2.f32 %v210_v9  ;;  %v649_v18 = vunpack.c.l.bf16 %v730_v24  ;;  %v650_v27 = vunpack.c.h.bf16 %v730_v24 }
  0x72   :  { %v493_v49 = vadd.f32 %v492_v17, %v478_v60  ;;  %v479_v54 = vmul.f32 0.5, %v620_v10  ;;  %v212_v30 = vmul.f32 1.442695, %v685_v25  ;;  %v214_v63 = vmul.f32 1.442695, %v686_v4 }
  0x73   :  { %v480_v3 = vmul.f32 0.5, %v621_v47  ;;  %v689_v21 = vunpack.c.l.bf16 %v1293_v57  ;;  %v713_v0 = vunpack.c.l.bf16 %v744_v58  ;;  %v714_v39 = vunpack.c.h.bf16 %v744_v58  ;;  %v747_v58 = vld [vmem:[#allocation9 + $0x38] sm:$0xff]  }
  0x74   :  { %v494_v55 = vadd.f32 %v493_v49, %v479_v54  ;;  %870 = vpow2.f32 %v212_v30  ;;  %v690_v5 = vunpack.c.h.bf16 %v1293_v57  ;;  %v238_v6 = vmul.f32 %v649_v18, %v1156_v1 }
  0x75   :  { %872 = vpow2.f32 %v214_v63  ;;  %v239_v32 = vmul.f32 %v650_v27, %v1156_v1  ;;  %v385_v7 = vmul.f32 -2.0, %v681_v15  ;;  %v216_v43 = vmul.f32 1.442695, %v689_v21 }
  0x76   :  { %v1295_v38 = vadd.f32 %v494_v55, %v480_v3  ;;  %v386_v12 = vmul.f32 -2.0, %v682_v42  ;;  %v218_v33 = vmul.f32 1.442695, %v690_v5  ;;  %v693_v44 = vunpack.c.l.bf16 %v1300_v31 }
  0x77   :  { %812 = vmatpush3.bf16.xpose.msra.mxu0 %v809_v11  ;;  %v694_v13 = vunpack.c.h.bf16 %v1300_v31  ;;  %v433_v19 = vmul.f32 %v238_v6, %v238_v6  ;;  %v434_v20 = vmul.f32 %v239_v32, %v239_v32  ;;  %v653_v26 = vunpack.c.l.bf16 %v731_v2 }
  0x78   :  { %814 = vmatprep.subr.bf16.mxu0 %v813_v14  ;;  %874 = vpow2.f32 %v216_v43  ;;  %v220_v29 = vmul.f32 1.442695, %v693_v44  ;;  %v654_v34 = vunpack.c.h.bf16 %v731_v2  ;;  %v717_v11 = vunpack.c.l.bf16 %v745_v28 }
  0x79   :  { %876 = vpow2.f32 %v218_v33  ;;  %v222_v48 = vmul.f32 1.442695, %v694_v13  ;;  %v718_v41 = vunpack.c.h.bf16 %v745_v28  ;;  %v240_v42 = vmul.f32 %v653_v26, %v1156_v1 }
  0x7a   :  { %v867_v16 = vpop.eup %866  ;;  %878 = vpow2.f32 %v220_v29  ;;  %v387_v60 = vmul.f32 -2.0, %v685_v25  ;;  %v657_v17 = vunpack.c.l.bf16 %v732_v22  ;;  %v658_v52 = vunpack.c.h.bf16 %v732_v22 }
  0x7b   :  { %v869_v45 = vpop.eup %868  ;;  %v254_v37 = vmin.f32 %v867_v16, 0.5  ;;  %v401_v15 = vmul.f32 %v867_v16, %v867_v16  ;;  %880 = vpow2.f32 %v222_v48  ;;  %v435_v49 = vmul.f32 %v240_v42, %v240_v42 }
  0x7c   :  { %v255_v35 = vmin.f32 %v869_v45, 0.5  ;;  %v402_v36 = vmul.f32 %v869_v45, %v869_v45  ;;  %v241_v3 = vmul.f32 %v654_v34, %v1156_v1  ;;  %v721_v27 = vunpack.c.l.bf16 %v746_v62 }
  0x7d   :  { %v270_v53 = vmul.f32 %v713_v0, %v254_v37  ;;  %v417_v40 = vadd.f32 %v401_v15, %v385_v7  ;;  %v722_v63 = vunpack.c.h.bf16 %v746_v62  ;;  %v242_v0 = vmul.f32 %v657_v17, %v1156_v1 }
  0x7e   :  { %v271_v50 = vmul.f32 %v714_v39, %v255_v35  ;;  %v418_v56 = vadd.f32 %v402_v36, %v386_v12  ;;  %v871_v61 = vpop.eup %870  ;;  %v1323_v39 = vmul.f32 %v658_v52, %v1156_v1  ;;  %v726_v28 = vunpack.c.h.bf16 %v747_v58 }
  0x7f   :  { %816 = vmatpush3.bf16.xpose.msra.mxu0 %v813_v14  ;;  %v286_v51 = vadd.f32 %v270_v53, %v238_v6  ;;  %v1317_v59 = vadd.f32 %v433_v19, %v417_v40  ;;  %v873_v9 = vpop.eup %872  ;;  %v256_v10 = vmin.f32 %v871_v61, 0.5  ;;  %v403_v47 = vmul.f32 %v871_v61, %v871_v61  ;;  %v733_v14 = vld [vmem:[#allocation6 + $0x38] sm:$0xff]  }
  0x80   :  { %v287_v46 = vadd.f32 %v271_v50, %v239_v32  ;;  %v450_v8 = vadd.f32 %v434_v20, %v418_v56  ;;  %v257_v24 = vmin.f32 %v873_v9, 0.5  ;;  %v661_v43 = vunpack.c.l.bf16 %v733_v14 }
  0x81   :  { %v272_v55 = vmul.f32 %v717_v11, %v256_v10  ;;  %v419_v18 = vadd.f32 %v403_v47, %v387_v60  ;;  %v662_v16 = vunpack.c.h.bf16 %v733_v14  ;;  %v725_v19 = vunpack.c.l.bf16 %v747_v58 }
  0x82   :  { %v817_v54 = vpack.c.bf16 %v287_v46, %v286_v51  ;;  %v875_v25 = vpop.eup %874  ;;  %v273_v30 = vmul.f32 %v718_v41, %v257_v24  ;;  %v244_v48 = vmul.f32 %v661_v43, %v1156_v1  ;;  %v295_v51 = vld [vmem:[#allocation3 + $0x8] sm:$0x1]  ;;  %v623_v46 = vadd.f32 -1.0, %v450_v8 }
  0x83   :  { %v877_v2 = vpop.eup %876  ;;  %v288_v6 = vadd.f32 %v272_v55, %v240_v42  ;;  %v451_v32 = vadd.f32 %v435_v49, %v419_v18  ;;  %v258_v7 = vmin.f32 %v875_v25, 0.5  ;;  %v245_v53 = vmul.f32 %v662_v16, %v1156_v1  ;;  %v527_v42 = vld [vmem:[%s1383_s6] sm:$0x1] }
  0x84   :  { %818 = vmatprep.subr.bf16.mxu0 %v817_v54  ;;  %v289_v12 = vadd.f32 %v273_v30, %v241_v3  ;;  %v259_v33 = vmin.f32 %v877_v2, 0.5  ;;  %v879_v20 = vpop.eup %878  ;;  %v528_v60 = vmul.f32 0.5, %v527_v42  ;;  %v622_v1 = vadd.f32 -1.0, %v1317_v59 }
  0x85   :  { %v274_v26 = vmul.f32 %v721_v27, %v258_v7  ;;  %v881_v45 = vpop.eup %880  ;;  %v260_v29 = vmin.f32 %v879_v20, 0.5  ;;  %v436_v17 = vmul.f32 %v241_v3, %v241_v3  ;;  %v388_v52 = vmul.f32 -2.0, %v686_v4 }
  0x86   :  { %v821_v37 = vpack.c.bf16 %v289_v12, %v288_v6  ;;  %v275_v15 = vmul.f32 %v722_v63, %v259_v33  ;;  %v261_v36 = vmin.f32 %v881_v45, 0.5  ;;  %v529_v61 = vmul.f32 1.442695, %v528_v60  ;;  %v526_v6 = vld [vmem:[%s1382_s5] sm:$0x1]  ;;  %s1037_s5 = smov [#allocation11]  }
  0x87   :  { %820 = vmatpush3.bf16.xpose.msra.mxu0 %v817_v54  ;;  %v290_v35 = vadd.f32 %v274_v26, %v242_v0  ;;  %v276_v40 = vmul.f32 %v725_v19, %v260_v29  ;;  %v404_v62 = vmul.f32 %v873_v9, %v873_v9  ;;  %v481_v10 = vmul.f32 0.5, %v622_v1  ;;  %s588_s7 = sshll.u32 %s1037_s5, 4  ;;  %s589_s7 = int_to_ptr.vmem [resolvable:$true] %s588_s7 }
  0x88   :  { %822 = vmatprep.subr.bf16.mxu0 %v821_v37  ;;  %v291_v34 = vadd.f32 %v275_v15, %v1323_v39  ;;  %v277_v11 = vmul.f32 %v726_v28, %v261_v36  ;;  %882 = vpow2.f32 %v529_v61  ;;  %v389_v49 = vmul.f32 -2.0, %v689_v21  ;;  %s974_s22 = scalar_lea.vmem %s589_s7, 128  ;;  %p979_p5 = scmp.lt.s32.totalorder %s589_s7, %s589_s7 }
  0x89   :  { %v292_v50 = vadd.f32 %v276_v40, %v244_v48  ;;  %v405_v54 = vmul.f32 %v875_v25, %v875_v25  ;;  %v420_v24 = vadd.f32 %v404_v62, %v388_v52  ;;  %v482_v14 = vmul.f32 0.5, %v623_v46  ;;  %p975_p4 = scmp.ne.s32.totalorder %s589_s7, %s974_s22  ;;  %p980_p6 = scmp.lt.s32.totalorder %s974_s22, %s974_s22 }
  0x8a   :  { %v825_v22 = vpack.c.bf16 %v291_v34, %v290_v35  ;;  %v293_v56 = vadd.f32 %v277_v11, %v245_v53  ;;  %v437_v55 = vmul.f32 %v242_v0, %v242_v0  ;;  %v390_v27 = vmul.f32 -2.0, %v690_v5 }
  0x8b   :  { %v406_v59 = vmul.f32 %v877_v2, %v877_v2  ;;  %v421_v8 = vadd.f32 %v405_v54, %v389_v49  ;;  %v452_v3 = vadd.f32 %v436_v17, %v420_v24  ;;  %v624_v4 = vadd.f32 -1.0, %v451_v32  ;;  %v297_v17 = vld [vmem:[#allocation2 + $0x8] sm:$0x1]  ;;  %p981_p7 = por %p980_p6, %p979_p5 }
  0x8c   :  { %v829_v41 = vpack.c.bf16 %v293_v56, %v292_v50  ;;  %v496_v9 = vadd.f32 %v1295_v38, %v481_v10  ;;  %v391_v21 = vmul.f32 -2.0, %v693_v44  ;;  %v407_v25 = vmul.f32 %v879_v20, %v879_v20 }
  0x8d   :  { %v422_v30 = vadd.f32 %v406_v59, %v390_v27  ;;  %v438_v57 = vmul.f32 %v1323_v39, %v1323_v39  ;;  %v453_v5 = vadd.f32 %v437_v55, %v421_v8  ;;  %v625_v63 = vadd.f32 -1.0, %v452_v3  ;;  %p982_p8 = pnand %p981_p7, %p975_p4 }
  0x8e   :  { %v483_v0 = vmul.f32 0.5, %v624_v4  ;;  %v497_v2 = vadd.f32 %v496_v9, %v482_v14  ;;  %v392_v38 = vmul.f32 -2.0, %v694_v13  ;;  %v408_v32 = vmul.f32 %v881_v45, %v881_v45 }
  0x8f   :  { %824 = vmatpush3.bf16.xpose.msra.mxu0 %v821_v37  ;;  %v423_v7 = vadd.f32 %v407_v25, %v391_v21  ;;  %v439_v43 = vmul.f32 %v244_v48, %v244_v48  ;;  %v454_v44 = vadd.f32 %v438_v57, %v422_v30  ;;  %v626_v12 = vadd.f32 -1.0, %v453_v5 }
  0x90   :  { %826 = vmatprep.subr.bf16.mxu0 %v825_v22  ;;  %v484_v33 = vmul.f32 0.5, %v625_v63  ;;  %v498_v16 = vadd.f32 %v497_v2, %v483_v0  ;;  %v424_v19 = vadd.f32 %v408_v32, %v392_v38  ;;  %v440_v39 = vmul.f32 %v245_v53, %v245_v53 }
  0x91   :  { %v455_v20 = vadd.f32 %v439_v43, %v423_v7  ;;  %v627_v28 = vadd.f32 -1.0, %v454_v44  ;;  %v485_v37 = vmul.f32 0.5, %v626_v12  ;;  %v555_v36 = vsub.f32 0.0, %v527_v42 }
  0x92   :  { %v883_v47 = vpop.eup %882  ;;  %v499_v15 = vadd.f32 %v498_v16, %v484_v33  ;;  %v456_v29 = vadd.f32 %v440_v39, %v424_v19  ;;  %v558_v45 = vmul.f32 %v526_v6, %v526_v6  ;;  %v513_v42 = vlaneseq }
  0x93   :  { %v531_v18 = vmin.f32 %v883_v47, 0.5  ;;  %v628_v35 = vadd.f32 -1.0, %v455_v20  ;;  %v556_v34 = vmul.f32 %v883_v47, %v883_v47  ;;  %v486_v31 = vmul.f32 0.5, %v627_v28 }
  0x94   :  { %v500_v13 = vadd.f32 %v499_v15, %v485_v37  ;;  %v629_v40 = vadd.f32 -1.0, %v456_v29  ;;  %v537_v1 = vshrl.u32 %v513_v42, 7 }
  0x95   :  { %v533_v58 = vmul.f32 %v532_v23, %v531_v18  ;;  %v487_v48 = vmul.f32 0.5, %v628_v35  ;;  %v557_v11 = vadd.f32 %v556_v34, %v555_v36 }
  0x96   :  { %v488_v50 = vmul.f32 0.5, %v629_v40  ;;  %v538_v46 = vsub.s32 0, %v537_v1 }
  0x97   :  { %828 = vmatpush3.bf16.xpose.msra.mxu0 %v825_v22  ;;  %v534_v26 = vadd.f32 %v533_v58, %v526_v6  ;;  %v501_v22 = vadd.f32 %v500_v13, %v486_v31  ;;  %v559_v56 = vadd.f32 %v558_v45, %v557_v11 }
  0x98   :  { %830 = vmatprep.subr.bf16.mxu0 %v829_v41 }
  0x99   :  { %v630_v53 = vadd.f32 -1.0, %v559_v56  ;;  %v539_v62 = vrot.slane %v534_v26, %v538_v46 }
  0x9b   :  { %v561_v60 = vmul.f32 0.5, %v630_v53 }
  0x9d   :  { %v562_v61 = vsel %vm544_vm0, %v561_v60, 0.0 }
  0x9e   :  { %563 = vadd.xlane.f32.xlu1 %v562_v61 }
  0x9f   :  { %832 = vmatpush3.bf16.xpose.msra.mxu0 %v829_v41  ;;  %v502_v41 = vadd.f32 %v501_v22, %v487_v48 }
  0xa6   :  { %799 = vmatmul.mubr.f32.vlgmr.msra.gmra.mrb[0].mxu0 %v295_v51  ;;  %v503_v51 = vadd.f32 %v502_v41, %v488_v50 }
  0xa8   :  { %504 = vadd.xlane.f32.xlu0 %v503_v51 }
 0x135   :  { %v505_v55 = vpop.xlane.xlu0 %504 }
 0x136   :  { %v506_v18 = vrot.slane %v505_v55, 4 }
 0x138   :  { %v507_v27 = vadd.f32 %v506_v18, %v505_v55 }
 0x13a   :  { %v508_v59 = vrot.slane %v507_v27, 2 }
 0x13c   :  { %v509_v8 = vadd.f32 %v508_v59, %v507_v27 }
 0x13e   :  { %v510_v3 = vrot.slane %v509_v8, 1 }
 0x140   :  { %v511_v23 = vadd.f32 %v510_v3, %v509_v8 }
 0x142   :  { %833 = vpush %v511_v23 }
 0x179   :  { %v800_v52 = vpop.f32.mrb[0].mxu0 }
 0x17a   :  { %v374_v10 = vadd.f32 %v800_v52, %v297_v17  ;;  %v364_v47 = vpop.f32.mrb[1].mxu0 }
 0x17b   :  { %v541_v49 = vadd.f32 %v539_v62, %v364_v47 }
 0x17c   :  { %376 = vst [vmem:[#allocation2 + $0x8] sm:$0x1] %v374_v10 }
 0x17d   :  { %542 = vst [vmem:[#allocation11] sm:$0xff] %v541_v49 }
 0x183   :  { %v525_v54 = vld [vmem:[#allocation2 + $0x8] sm:$0x1] }
 0x184   :  { %884 = vtanh.f32 %v525_v54 }
 0x18e   :  { %v885_v24 = vpop.eup %884 }
 0x18f   :  { %v545_v14 = vsel %vm544_vm0, %v885_v24, 0.0 }
 0x190   :  { %546 = vadd.xlane.f32.xlu0 %v545_v14 }
 0x191   :  { %985 = shalt.err (!%p982_p8)
}
 0x192   :  { %s986_s26 = scalar_lea.hbm %s1385_s8, 128 }
 0x193   :  { %p987_p9 = scmp.ne.s32.totalorder %s1385_s8, %s986_s26  ;;  %p990_p10 = scmp.lt.u32.totalorder %s986_s26, %s1385_s8 }
 0x195   :  { %p992_p11 = pnand %p990_p10, %p987_p9 }
 0x197   :  { %995 = shalt.err (!%p992_p11)
}
 0x198   :  { %591 = dma.vmem_to_hbm [thread:$0]  %s589_s7, 128, %s1385_s8, [#allocation5]   ;;  %v564_v4 = vpop.xlane.xlu1 %563  ;;  %v514_v7 = vand.u32 127, %v513_v42 }
 0x199   :  { %v565_v9 = vrot.slane %v564_v4, 4  ;;  %s834_s11 = spop %833  ;;  %s1038_s1 = smov [#allocation12]  }
 0x19a   :  { %vm516_vm1 = vcmp.eq.s32.totalorder %v514_v7, 0  ;;  %v517_v43 = vstv %s834_s11  ;;  %vm573_vm2 = vcmp.eq.s32.totalorder %v514_v7, 1  ;;  %vm576_vm3 = vcmp.eq.s32.totalorder %v514_v7, 2  ;;  %s598_s10 = sshll.u32 %s1038_s1, 4  ;;  %s599_s10 = int_to_ptr.vmem [resolvable:$true] %s598_s10 }
 0x19b   :  { %v566_v58 = vadd.f32 %v565_v9, %v564_v4  ;;  %v518_v44 = vsel %vm516_vm1, %v517_v43, 0.0  ;;  %s996_s13 = scalar_lea.vmem %s599_s10, 128  ;;  %p1001_p13 = scmp.lt.s32.totalorder %s599_s10, %s599_s10 }
 0x19c   :  { %p997_p12 = scmp.ne.s32.totalorder %s599_s10, %s996_s13  ;;  %p1002_p0 = scmp.lt.s32.totalorder %s996_s13, %s996_s13 }
 0x19d   :  { %v567_v21 = vrot.slane %v566_v58, 2 }
 0x19e   :  { %p1003_p1 = por %p1002_p0, %p1001_p13 }
 0x19f   :  { %v568_v5 = vadd.f32 %v567_v21, %v566_v58 }
 0x1a0   :  { %p1004_p2 = pnand %p1003_p1, %p997_p12 }
 0x1a1   :  { %v569_v2 = vrot.slane %v568_v5, 1 }
 0x1a3   :  { %v570_v32 = vadd.f32 %v569_v2, %v568_v5 }
 0x21d   :  { %v547_v25 = vpop.xlane.xlu0 %546 }
 0x21e   :  { %v548_v30 = vrot.slane %v547_v25, 4 }
 0x220   :  { %v549_v57 = vadd.f32 %v548_v30, %v547_v25 }
 0x222   :  { %v550_v63 = vrot.slane %v549_v57, 2 }
 0x224   :  { %v551_v0 = vadd.f32 %v550_v63, %v549_v57 }
 0x226   :  { %v552_v6 = vrot.slane %v551_v0, 1 }
 0x228   :  { %v553_v38 = vadd.f32 %v552_v6, %v551_v0 }
 0x22a   :  { %835 = vpush %v553_v38 }
 0x22b   :  { %837 = vpush %v570_v32 }
 0x25b   :  { %s836_s8 = spop %835 }
 0x25c   :  { %v574_v12 = vstv %s836_s8  ;;  %s838_s12 = spop %837 }
 0x25d   :  { %v575_v33 = vsel %vm573_vm2, %v574_v12, 0.0  ;;  %v577_v16 = vstv %s838_s12 }
 0x25e   :  { %v578_v19 = vsel %vm576_vm3, %v577_v16, 0.0 }
 0x25f   :  { %v579_v39 = vadd.f32 %v578_v19, %v575_v33 }
 0x261   :  { %v580_v20 = vadd.f32 %v579_v39, %v518_v44 }
 0x263   :  { %581 = vst [vmem:[#allocation12] sm:$0xff] %v580_v20 }
 0x264   :  { %1007 = shalt.err (!%p1004_p2)
}
 0x265   :  { %s1008_s2 = scalar_lea.hbm %s1386_s9, 128 }
 0x266   :  { %p1009_p3 = scmp.ne.s32.totalorder %s1386_s9, %s1008_s2  ;;  %p1012_p4 = scmp.lt.u32.totalorder %s1008_s2, %s1386_s9 }
 0x268   :  { %p1014_p5 = pnand %p1012_p4, %p1009_p3 }
 0x26a   :  { %1017 = shalt.err (!%p1014_p5)
}
 0x26b   :  { %601 = dma.vmem_to_hbm [thread:$0]  %s599_s10, 128, %s1386_s9, [#allocation13]  }
 0x26c   :  { %1024 = dma.done.wait [#allocation5], 128  }
 0x26d   :  { %1025 = vsyncadd [#allocation5], 4294967168 }
 0x26e   :  { %1026 = dma.done.wait [#allocation13], 128  }
 0x26f   :  { %1027 = vsyncadd [#allocation13], 4294967168 }
 0x270   :  { %608 = vsyncpa [#allocation4], 1 }
 0x271   :  { %609 = vsyncpa [#allocation7], 1 }
 0x272   :  { %610 = vsyncpa [#allocation10], 1 }
 0x273   :  { %611 = vsyncpa [#allocation5], 1 }
 0x274   :  { %612 = vsyncpa [#allocation13], 1 }

</bundles_post_ra>
